<compile_context>
chip_gen: v5e
topology: v5e:2x2
jax: 0.10.0
libtpu: 0.0.40
codegen_flags: <defaults>
</compile_context>

<pallas_src>
import functools

import jax
import jax.numpy as jnp
import numpy as np
from jax.experimental import pallas as pl
from jax.experimental.pallas import tpu as pltpu


def _round_up(x, m):
  return -(-x // m) * m


# ----------------------------------------------------------------------------
# Kernel
# ----------------------------------------------------------------------------
def _text_model_kernel(ids_ref, labels_ref, w1_ref, w2_ref, w3_ref, bias_ref,
                       out_ref, *, d, t2p, d2p, gce, q):
  f32 = jnp.float32
  bf16 = jnp.bfloat16

  ids = ids_ref[...]                  # [TB, S] bf16 (pre-sliced/cast in wrapper)
  labels = labels_ref[...]            # [TB, 1] f32
  tb = ids.shape[0]
  slab_w = out_ref.shape[1]

  benc = bias_ref[0:1, :t2p]          # [1, 2Tp]
  b1 = bias_ref[1:2, :d2p]            # [1, 2Dp]
  bfe = bias_ref[2:3, :d2p]           # [1, 2Dp]
  wfin = bias_ref[3:4, :d2p]          # [1, 2Dp]  (c-half and pad lanes are zero)
  bfin = bias_ref[4:5, 0:1]           # [1, 1]

  # TODO(synk): BertTextEncoder(...)[:, 0, :] (pretrained BERT) has no clean
  # in-kernel equivalent; replaced by a deterministic tanh-linear encoder
  # producing the [CLS]-like feature of width text_out (per branch).
  enc = jnp.tanh(
      jnp.dot(ids, w1_ref[...], preferred_element_type=f32) + benc)   # [TB, 2Tp]
  # post_text_dropout: eval-mode semantics (identity).
  h = jnp.maximum(
      jnp.dot(enc.astype(bf16), w2_ref[...], preferred_element_type=f32)
      + b1, 0.0)                                                       # [TB, 2Dp]
  feat = jnp.maximum(
      jnp.dot(h.astype(bf16), w3_ref[...], preferred_element_type=f32)
      + bfe, 0.0)                                                      # [TB, 2Dp]

  # model_b.final: N=1 head as VPU multiply + XLU lane reduce (only the
  # b-branch lanes of `wfin` are non-zero).
  scores_b1 = jnp.sum(feat * wfin, axis=-1, keepdims=True) + bfin      # [TB, 1]

  # L1Loss(reduction='none'); .detach() is a grad-only concept (numeric no-op).
  l1 = jnp.abs(scores_b1 - labels)                                     # [TB, 1]

  # GeneralizedCELoss, per-row. The batch mean is finalized in the wrapper so
  # it stays correct when the kernel is tiled over B.
  if gce == 'tanh':
    inv = 1.0 / jnp.maximum(l1, 1e-20)   # clamp: avoid inf/NaN when l1 == 0
    loss_dis = jnp.tanh(inv ** q) * l1
  elif gce == 'sigmoid':
    loss_dis = 2.0 * jax.nn.sigmoid(-l1) * l1
  else:
    loss_dis = jnp.zeros_like(l1)

  # Assemble the lane-dense output slab in registers (full-width VPU selects,
  # no zero-fill pass, no masked single-lane stores) -> ONE unmasked store.
  if d2p >= slab_w:
    feat_slab = feat[:, :slab_w]
  else:
    feat_slab = jnp.concatenate(
        [feat, jnp.zeros((tb, slab_w - d2p), f32)], axis=-1)
  lane = jax.lax.broadcasted_iota(jnp.int32, (tb, slab_w), 1)
  extras = jnp.where(lane == d, scores_b1,
                     jnp.where(lane == d + 1, l1,
                               jnp.where(lane == d + 2, loss_dis, 0.0)))
  out_ref[...] = jnp.where(lane < d, feat_slab, extras)


# ----------------------------------------------------------------------------
# Wrapper-side parameter packing (done once, not per kernel invocation)
# ----------------------------------------------------------------------------
def pack_params(params):
  (wenc_c, benc_c, w1_c, b1_c, wf_c, bf_c,
   wenc_b, benc_b, w1_b, b1_b, wf_b, bf_b, wfin_b, bfin_b) = params
  S, T = wenc_c.shape
  D = w1_c.shape[1]
  T2, D2 = 2 * T, 2 * D
  # Lane-pad fused output dims to 128 multiples -> tile-aligned MXU operands.
  T2p = _round_up(T2, 128)
  D2p = _round_up(D2, 128)
  Wb = max(T2p, D2p)
  bf16 = jnp.bfloat16

  # Fused bf16 weight slabs (block-diagonal is mathematically identical to the
  # two independent branches; zero blocks / pad columns accumulate exactly).
  w1 = jnp.zeros((S, T2p), jnp.float32)
  w1 = w1.at[:, :T].set(wenc_c).at[:, T:T2].set(wenc_b).astype(bf16)      # [S, 2Tp]

  w2 = jnp.zeros((T2p, D2p), jnp.float32)
  w2 = w2.at[:T, :D].set(w1_c).at[T:T2, D:D2].set(w1_b).astype(bf16)      # [2Tp, 2Dp]

  w3 = jnp.zeros((D2p, D2p), jnp.float32)
  w3 = w3.at[:D, :D].set(wf_c).at[D:D2, D:D2].set(wf_b).astype(bf16)      # [2Dp, 2Dp]

  def row(pairs):
    r = jnp.zeros((Wb,), jnp.float32)
    for vec, off in pairs:
      vec = vec.reshape(-1)
      r = r.at[off:off + vec.shape[0]].set(vec)
    return r.reshape(1, Wb)

  bias = jnp.concatenate([
      row([(benc_c, 0), (benc_b, T)]),   # encoder bias
      row([(b1_c, 0), (b1_b, D)]),       # post_text_layer_1 bias
      row([(bf_c, 0), (bf_b, D)]),       # feature bias
      row([(wfin_b, D)]),                # final head weight (b-branch lanes only)
      row([(bfin_b, 0)]),                # final head bias
  ], axis=0).astype(jnp.float32)                                           # [5, Wb]

  return dict(w1=w1, w2=w2, w3=w3, bias=bias, d=D, t2p=T2p, d2p=D2p)


# ----------------------------------------------------------------------------
# Forward wrapper
# ----------------------------------------------------------------------------
def text_model_forward(text, labels, packed, *, gce='sigmoid', q=0.7,
                       lambda_dis=1.0, tb=None):
  w1, w2, w3, bias = packed['w1'], packed['w2'], packed['w3'], packed['bias']
  D, T2p, D2p = packed['d'], packed['t2p'], packed['d2p']
  B = text.shape[0]
  S = w1.shape[0]
  Wb = bias.shape[1]
  slab_w = _round_up(D + 3, 128)

  # Pre-slice the token-id row and pre-cast to bf16 in XLA: the kernel only
  # DMAs a lane-friendly [B, S] bf16 array (mask / segment rows are dead, and
  # the MXU path is bf16 anyway).
  ids = text[:, 0, :].astype(jnp.bfloat16)
  labels = labels.astype(jnp.float32)

  # Batch tile: multiple of 8 sublanes (or the full batch), sized so the
  # double-buffered ids/labels/out tiles + resident weight slabs fit within a
  # conservative slice of the 32 MiB scoped-VMEM budget (v7x-safe; portable to
  # v5e/v6e with the same kernel shape).
  weight_bytes = w1.size * 2 + w2.size * 2 + w3.size * 2 + bias.size * 4
  if tb is None:
    tb = min(B, 512)
  if tb < B:
    tb = max(8, (tb // 8) * 8)

  def tile_bytes(t):
    return 2 * (t * S * 2 + t * 4 + t * slab_w * 4) + 2 * weight_bytes

  while tb > 8 and tile_bytes(tb) > 24 * 1024 * 1024:
    tb = max(8, tb // 2)
  grid = (pl.cdiv(B, tb),)

  flops = 2 * B * (S * T2p + T2p * D2p + D2p * D2p) + 4 * B * D2p
  transcendentals = B * T2p + 2 * B                       # tanh + sigmoid/exp
  bytes_accessed = (ids.size * 2 + labels.size * 4 + weight_bytes
                    + B * slab_w * 4)

  kernel = functools.partial(_text_model_kernel, d=D, t2p=T2p, d2p=D2p,
                             gce=gce, q=q)

  slab = pl.pallas_call(
      kernel,
      out_shape=jax.ShapeDtypeStruct((B, slab_w), jnp.float32),
      grid=grid,
      in_specs=[
          pl.BlockSpec((tb, S), lambda i: (i, 0)),       # ids: tiled over batch
          pl.BlockSpec((tb, 1), lambda i: (i, 0)),       # labels
          pl.BlockSpec((S, T2p), lambda i: (0, 0)),      # weights: VMEM-resident
          pl.BlockSpec((T2p, D2p), lambda i: (0, 0)),
          pl.BlockSpec((D2p, D2p), lambda i: (0, 0)),
          pl.BlockSpec((5, Wb), lambda i: (0, 0)),
      ],
      out_specs=pl.BlockSpec((tb, slab_w), lambda i: (i, 0)),
      compiler_params=pltpu.CompilerParams(
          dimension_semantics=("parallel",),
          vmem_limit_bytes=32 * 1024 * 1024),
      cost_estimate=pl.CostEstimate(flops=flops,
                                    transcendentals=transcendentals,
                                    bytes_accessed=bytes_accessed),
  )(ids, labels, w1, w2, w3, bias)

  feature_c = slab[:, 0:D]                  # [B, D]
  scores_b1 = slab[:, D:D + 1]              # [B, 1]
  loss_b = slab[:, D + 1:D + 2]             # [B, 1]  L1 (detached)
  loss_dis = slab[:, D + 2:D + 3]           # [B, 1]  per-row GCE loss
  loss = lambda_dis * jnp.mean(loss_dis)    # finalize batch mean in XLA
  return loss, loss_b, scores_b1, feature_c


# ----------------------------------------------------------------------------
# Deterministic parameter init (shapes implied by the module __init__)
# ----------------------------------------------------------------------------
def init_params(key, S, T, D):
  ks = jax.random.split(key, 14)

  def lin(k, fan_in, shape):
    return jax.random.uniform(k, shape, jnp.float32, -1.0, 1.0) / np.sqrt(fan_in)

  # model_c
  wenc_c = lin(ks[0], S, (S, T)); benc_c = lin(ks[1], S, (1, T))
  w1_c = lin(ks[2], T, (T, D));   b1_c = lin(ks[3], T, (1, D))
  wf_c = lin(ks[4], D, (D, D));   bf_c = lin(ks[5], D, (1, D))
  # model_b
  wenc_b = lin(ks[6], S, (S, T)); benc_b = lin(ks[7], S, (1, T))
  w1_b = lin(ks[8], T, (T, D));   b1_b = lin(ks[9], T, (1, D))
  wf_b = lin(ks[10], D, (D, D));  bf_b = lin(ks[11], D, (1, D))
  wfin_b = lin(ks[12], D, (D, 1)); bfin_b = lin(ks[13], D, (1, 1))

  return (wenc_c, benc_c, w1_c, b1_c, wf_c, bf_c,
          wenc_b, benc_b, w1_b, b1_b, wf_b, bf_b, wfin_b, bfin_b)


# ----------------------------------------------------------------------------
# Pure-JAX reference (unfused branches; same bf16 MXU casts, f32 accumulation)
# ----------------------------------------------------------------------------
def reference(text, labels, params, gce='sigmoid', q=0.7, lambda_dis=1.0):
  (wenc_c, benc_c, w1_c, b1_c, wf_c, bf_c,
   wenc_b, benc_b, w1_b, b1_b, wf_b, bf_b, wfin_b, bfin_b) = params
  ids = text[:, 0, :].astype(jnp.float32)
  bf16 = jnp.bfloat16

  def mm(a, w):
    return jnp.dot(a.astype(bf16), w.astype(bf16),
                   preferred_element_type=jnp.float32)

  def branch(wenc, benc, w1, b1, wf, bf):
    enc = jnp.tanh(mm(ids, wenc) + benc)
    h = jax.nn.relu(mm(enc, w1) + b1)
    return jax.nn.relu(mm(h, wf) + bf)

  feat_c = branch(wenc_c, benc_c, w1_c, b1_c, wf_c, bf_c)
  feat_b = branch(wenc_b, benc_b, w1_b, b1_b, wf_b, bf_b)
  s = jnp.sum(feat_b * wfin_b.reshape(1, -1), axis=-1, keepdims=True) + bfin_b
  l1 = jnp.abs(s - labels)
  if gce == 'tanh':
    ld = jnp.tanh((1.0 / jnp.maximum(l1, 1e-20)) ** q) * l1
  elif gce == 'sigmoid':
    ld = 2.0 * jax.nn.sigmoid(-l1) * l1
  else:
    ld = jnp.zeros_like(l1)
  return lambda_dis * ld.mean(), l1, s, feat_c


# ----------------------------------------------------------------------------
if __name__ == "__main__":
  B, S, T, D = 8, 16, 32, 32   # batch, seq, text_out, post_text_dim

  key = jax.random.PRNGKey(0)
  k_ids, k_lab, k_par = jax.random.split(key, 3)

  ids = jax.random.randint(k_ids, (B, S), 0, 100).astype(jnp.float32) / 100.0
  mask = jnp.ones((B, S), jnp.float32)
  seg = jnp.zeros((B, S), jnp.float32)
  text = jnp.stack([ids, mask, seg], axis=1)             # [B, 3, S]
  labels = jax.random.uniform(k_lab, (B, 1), jnp.float32, -1.0, 1.0)

  params = init_params(k_par, S, T, D)
  packed = pack_params(params)

  outs = text_model_forward(text, labels, packed,
                            gce='sigmoid', q=0.7, lambda_dis=1.0)
  outs = jax.block_until_ready(outs)
  loss, loss_b, scores_b1, feat_c = outs

  # sanity-check against pure-JAX reference
  ref_loss, ref_loss_b, ref_s, ref_feat_c = reference(text, labels, params)
  np.testing.assert_allclose(np.asarray(loss), np.asarray(ref_loss),
                             rtol=5e-4, atol=5e-5)
  np.testing.assert_allclose(np.asarray(loss_b), np.asarray(ref_loss_b),
                             rtol=5e-4, atol=5e-5)
  np.testing.assert_allclose(np.asarray(scores_b1), np.asarray(ref_s),
                             rtol=5e-4, atol=5e-5)
  np.testing.assert_allclose(np.asarray(feat_c), np.asarray(ref_feat_c),
                             rtol=5e-4, atol=5e-5)

  print("KERNEL_OK")
</pallas_src>

<mosaic_0001>
module attributes {stable_mosaic.version = 11 : i64} {
  func.func @_text_model_kernel(%arg0: i32, %arg1: memref<8x16xbf16, #tpu.memory_space<vmem>>, %arg2: memref<8x1xf32, #tpu.memory_space<vmem>>, %arg3: memref<16x128xbf16, #tpu.memory_space<vmem>>, %arg4: memref<128x128xbf16, #tpu.memory_space<vmem>>, %arg5: memref<128x128xbf16, #tpu.memory_space<vmem>>, %arg6: memref<5x128xf32, #tpu.memory_space<vmem>>, %arg7: memref<8x128xf32, #tpu.memory_space<vmem>>) attributes {dimension_semantics = [#tpu.dimension_semantics<parallel>], iteration_bounds = array<i64: 1>, scalar_prefetch = 0 : i64, scratch_operands = 0 : i64, tpu.core_type = #tpu.core_type<tc>, window_params = [{transform_indices = @transform_0, window_bounds = array<i64: 8, 16>}, {transform_indices = @transform_1, window_bounds = array<i64: 8, 1>}, {pipeline_mode = #tpu.pipeline_mode<synchronous>, transform_indices = @transform_2, window_bounds = array<i64: 16, 128>}, {pipeline_mode = #tpu.pipeline_mode<synchronous>, transform_indices = @transform_3, window_bounds = array<i64: 128, 128>}, {pipeline_mode = #tpu.pipeline_mode<synchronous>, transform_indices = @transform_4, window_bounds = array<i64: 128, 128>}, {pipeline_mode = #tpu.pipeline_mode<synchronous>, transform_indices = @transform_5, window_bounds = array<i64: 5, 128>}, {transform_indices = @transform_6, window_bounds = array<i64: 8, 128>}]} {
    %c0 = arith.constant 0 : index
    %c0_0 = arith.constant 0 : index
    %0 = vector.load %arg1[%c0, %c0_0] : memref<8x16xbf16, #tpu.memory_space<vmem>>, vector<8x16xbf16>
    %c0_1 = arith.constant 0 : index
    %c0_2 = arith.constant 0 : index
    %1 = vector.load %arg2[%c0_1, %c0_2] : memref<8x1xf32, #tpu.memory_space<vmem>>, vector<8x1xf32>
    %c0_3 = arith.constant 0 : index
    %c0_4 = arith.constant 0 : index
    %2 = vector.load %arg6[%c0_3, %c0_4] : memref<5x128xf32, #tpu.memory_space<vmem>>, vector<1x128xf32>
    %c1 = arith.constant 1 : index
    %c0_5 = arith.constant 0 : index
    %3 = vector.load %arg6[%c1, %c0_5] : memref<5x128xf32, #tpu.memory_space<vmem>>, vector<1x128xf32>
    %c2 = arith.constant 2 : index
    %c0_6 = arith.constant 0 : index
    %4 = vector.load %arg6[%c2, %c0_6] : memref<5x128xf32, #tpu.memory_space<vmem>>, vector<1x128xf32>
    %c3 = arith.constant 3 : index
    %c0_7 = arith.constant 0 : index
    %5 = vector.load %arg6[%c3, %c0_7] : memref<5x128xf32, #tpu.memory_space<vmem>>, vector<1x128xf32>
    %c4 = arith.constant 4 : index
    %c0_8 = arith.constant 0 : index
    %6 = vector.load %arg6[%c4, %c0_8] : memref<5x128xf32, #tpu.memory_space<vmem>>, vector<1x1xf32>
    %c0_9 = arith.constant 0 : index
    %c0_10 = arith.constant 0 : index
    %7 = vector.load %arg3[%c0_9, %c0_10] : memref<16x128xbf16, #tpu.memory_space<vmem>>, vector<16x128xbf16>
    %cst = arith.constant dense<0.000000e+00> : vector<8x128xf32>
    %8 = tpu.matmul %0, %7, %cst {dimension_numbers = #tpu.dot_dimension_numbers<[1], [0], [0], [1], [0, 0, 1, 1], [], []>} : vector<8x16xbf16>, vector<16x128xbf16>, vector<8x128xf32> -> vector<8x128xf32>
    %9 = vector.broadcast %2 : vector<1x128xf32> to vector<8x128xf32>
    %10 = arith.addf %8, %9 : vector<8x128xf32>
    %11 = math.tanh %10 : vector<8x128xf32>
    %12 = arith.truncf %11 : vector<8x128xf32> to vector<8x128xbf16>
    %c0_11 = arith.constant 0 : index
    %c0_12 = arith.constant 0 : index
    %13 = vector.load %arg4[%c0_11, %c0_12] : memref<128x128xbf16, #tpu.memory_space<vmem>>, vector<128x128xbf16>
    %cst_13 = arith.constant dense<0.000000e+00> : vector<8x128xf32>
    %14 = tpu.matmul %12, %13, %cst_13 {dimension_numbers = #tpu.dot_dimension_numbers<[1], [0], [0], [1], [0, 0, 1, 1], [], []>} : vector<8x128xbf16>, vector<128x128xbf16>, vector<8x128xf32> -> vector<8x128xf32>
    %15 = vector.broadcast %3 : vector<1x128xf32> to vector<8x128xf32>
    %16 = arith.addf %14, %15 : vector<8x128xf32>
    %cst_14 = arith.constant 0.000000e+00 : f32
    %17 = vector.broadcast %cst_14 : f32 to vector<8x128xf32>
    %18 = arith.maximumf %16, %17 : vector<8x128xf32>
    %19 = arith.truncf %18 : vector<8x128xf32> to vector<8x128xbf16>
    %c0_15 = arith.constant 0 : index
    %c0_16 = arith.constant 0 : index
    %20 = vector.load %arg5[%c0_15, %c0_16] : memref<128x128xbf16, #tpu.memory_space<vmem>>, vector<128x128xbf16>
    %cst_17 = arith.constant dense<0.000000e+00> : vector<8x128xf32>
    %21 = tpu.matmul %19, %20, %cst_17 {dimension_numbers = #tpu.dot_dimension_numbers<[1], [0], [0], [1], [0, 0, 1, 1], [], []>} : vector<8x128xbf16>, vector<128x128xbf16>, vector<8x128xf32> -> vector<8x128xf32>
    %22 = vector.broadcast %4 : vector<1x128xf32> to vector<8x128xf32>
    %23 = arith.addf %21, %22 : vector<8x128xf32>
    %cst_18 = arith.constant 0.000000e+00 : f32
    %24 = vector.broadcast %cst_18 : f32 to vector<8x128xf32>
    %25 = arith.maximumf %23, %24 : vector<8x128xf32>
    %26 = vector.broadcast %5 : vector<1x128xf32> to vector<8x128xf32>
    %27 = arith.mulf %25, %26 : vector<8x128xf32>
    %cst_19 = arith.constant dense<0.000000e+00> : vector<8xf32>
    %28 = vector.multi_reduction <add>, %27, %cst_19 [1] : vector<8x128xf32> to vector<8xf32>
    %29 = vector.shape_cast %28 : vector<8xf32> to vector<8x1xf32>
    %30 = vector.broadcast %6 : vector<1x1xf32> to vector<8x1xf32>
    %31 = arith.addf %29, %30 : vector<8x1xf32>
    %32 = arith.subf %31, %1 : vector<8x1xf32>
    %33 = math.absf %32 : vector<8x1xf32>
    %cst_20 = arith.constant 0.000000e+00 : f32
    %34 = vector.broadcast %cst_20 : f32 to vector<8x1xf32>
    %35 = arith.subf %34, %33 : vector<8x1xf32>
    %36 = arith.negf %35 : vector<8x1xf32>
    %37 = math.exp %36 : vector<8x1xf32>
    %cst_21 = arith.constant 1.000000e+00 : f32
    %38 = vector.broadcast %cst_21 : f32 to vector<8x1xf32>
    %39 = arith.addf %38, %37 : vector<8x1xf32>
    %40 = arith.divf %38, %39 : vector<8x1xf32>
    %cst_22 = arith.constant 2.000000e+00 : f32
    %41 = vector.broadcast %cst_22 : f32 to vector<8x1xf32>
    %42 = arith.mulf %41, %40 : vector<8x1xf32>
    %43 = arith.mulf %42, %33 : vector<8x1xf32>
    %44 = tpu.iota {dimensions = array<i32: 1>} : vector<8x128xi32>
    %c32_i32 = arith.constant 32 : i32
    %45 = vector.broadcast %c32_i32 : i32 to vector<8x128xi32>
    %46 = arith.cmpi eq, %44, %45 : vector<8x128xi32>
    %c33_i32 = arith.constant 33 : i32
    %47 = vector.broadcast %c33_i32 : i32 to vector<8x128xi32>
    %48 = arith.cmpi eq, %44, %47 : vector<8x128xi32>
    %c34_i32 = arith.constant 34 : i32
    %49 = vector.broadcast %c34_i32 : i32 to vector<8x128xi32>
    %50 = arith.cmpi eq, %44, %49 : vector<8x128xi32>
    %cst_23 = arith.constant 0.000000e+00 : f32
    %51 = vector.shape_cast %43 : vector<8x1xf32> to vector<8x1xf32>
    %52 = vector.broadcast %51 : vector<8x1xf32> to vector<8x128xf32>
    %53 = vector.broadcast %cst_23 : f32 to vector<8x128xf32>
    %54 = arith.select %50, %52, %53 : vector<8x128xi1>, vector<8x128xf32>
    %55 = vector.shape_cast %33 : vector<8x1xf32> to vector<8x1xf32>
    %56 = vector.broadcast %55 : vector<8x1xf32> to vector<8x128xf32>
    %57 = arith.select %48, %56, %54 : vector<8x128xi1>, vector<8x128xf32>
    %58 = vector.shape_cast %31 : vector<8x1xf32> to vector<8x1xf32>
    %59 = vector.broadcast %58 : vector<8x1xf32> to vector<8x128xf32>
    %60 = arith.select %46, %59, %57 : vector<8x128xi1>, vector<8x128xf32>
    %c32_i32_24 = arith.constant 32 : i32
    %61 = vector.broadcast %c32_i32_24 : i32 to vector<8x128xi32>
    %62 = arith.cmpi slt, %44, %61 : vector<8x128xi32>
    %63 = arith.select %62, %25, %60 : vector<8x128xi1>, vector<8x128xf32>
    %c0_25 = arith.constant 0 : index
    %c0_26 = arith.constant 0 : index
    %64 = vector.load %arg7[%c0_25, %c0_26] : memref<8x128xf32, #tpu.memory_space<vmem>>, vector<8x128xf32>
    tpu.vector_store %arg7[%c0_25, %c0_26], %63 {strides = array<i32>} : memref<8x128xf32, #tpu.memory_space<vmem>>, vector<8x128xf32>,
    return
  }
  func.func @transform_0(%arg0: i32) -> (i32, i32) {
    %c0_i32 = arith.constant 0 : i32
    %c0_i32_0 = arith.constant 0 : i32
    return %arg0, %c0_i32 : i32, i32
  }
  func.func @transform_1(%arg0: i32) -> (i32, i32) {
    %c0_i32 = arith.constant 0 : i32
    %c0_i32_0 = arith.constant 0 : i32
    return %arg0, %c0_i32 : i32, i32
  }
  func.func @transform_2(%arg0: i32) -> (i32, i32) {
    %c0_i32 = arith.constant 0 : i32
    %c0_i32_0 = arith.constant 0 : i32
    %c0_i32_1 = arith.constant 0 : i32
    return %c0_i32, %c0_i32_0 : i32, i32
  }
  func.func @transform_3(%arg0: i32) -> (i32, i32) {
    %c0_i32 = arith.constant 0 : i32
    %c0_i32_0 = arith.constant 0 : i32
    %c0_i32_1 = arith.constant 0 : i32
    return %c0_i32, %c0_i32_0 : i32, i32
  }
  func.func @transform_4(%arg0: i32) -> (i32, i32) {
    %c0_i32 = arith.constant 0 : i32
    %c0_i32_0 = arith.constant 0 : i32
    %c0_i32_1 = arith.constant 0 : i32
    return %c0_i32, %c0_i32_0 : i32, i32
  }
  func.func @transform_5(%arg0: i32) -> (i32, i32) {
    %c0_i32 = arith.constant 0 : i32
    %c0_i32_0 = arith.constant 0 : i32
    %c0_i32_1 = arith.constant 0 : i32
    return %c0_i32, %c0_i32_0 : i32, i32
  }
  func.func @transform_6(%arg0: i32) -> (i32, i32) {
    %c0_i32 = arith.constant 0 : i32
    %c0_i32_0 = arith.constant 0 : i32
    return %arg0, %c0_i32 : i32, i32
  }
}

</mosaic_0001>

<bundles_post_ra>
// kernel: tpu_custom_call.1
= control target key start
LH: loop header
LB: loop body
LE: loop exit
PB: predicated region body
PF: predicated region fallthrough
CT: control target
= control target key end

     0   :  { %11 = vsyncpa [#allocation3], 0  ;;  %s653_s0 = inlined_call_operand.hbm [shape: bf16[8,16], index: 0, kind: input, shape index: {}]   ;;  %s654_s1 = inlined_call_operand.vmem [shape: f32[8,1], index: 1, kind: input, shape index: {}]   ;;  %s655_s2 = inlined_call_operand.vmem [shape: bf16[16,128], index: 2, kind: input, shape index: {}]   ;;  %s656_s3 = inlined_call_operand.hbm [shape: bf16[128,128], index: 3, kind: input, shape index: {}]   ;;  %s657_s4 = inlined_call_operand.hbm [shape: bf16[128,128], index: 4, kind: input, shape index: {}]   ;;  %s658_s5 = inlined_call_operand.hbm [shape: f32[5,128], index: 5, kind: input, shape index: {}]   ;;  %s659_s6 = inlined_call_operand.hbm [shape: f32[8,128], index: 6, kind: output, shape index: {}]  }
   0x1   :  { %12 = vsyncpa [#allocation6], 0 }
   0x2   :  { %13 = vsyncpa [#allocation9], 0  ;;  %s34_s23 = sshll.u32 %s656_s3, 4  ;;  %s35_s23 = int_to_ptr.hbm [resolvable:$true] %s34_s23 }
   0x3   :  { %14 = vsyncpa [#allocation4], 0  ;;  %s589_s24 = smov [#allocation5]   ;;  %s20_s28 = sshll.u32 %s653_s0, 4  ;;  %s21_s28 = int_to_ptr.hbm [resolvable:$true] %s20_s28 }
   0x4   :  { %s36_s25 = sshll.u32 %s589_s24, 4  ;;  %s590_s29 = smov 64   ;;  %s37_s25 = int_to_ptr.vmem [resolvable:$true] %s36_s25 }
   0x5   :  { %s591_s30 = smov 4   ;;  %s592_s7 = smov [#allocation2]  }
   0x6   :  { %42 = dma.hbm_to_vmem [thread:$0]  %s35_s23, 1024, %s37_s25, [#allocation6], %s590_s29, %s590_s29, %s591_s30  }
   0x7   :  { %s22_s8 = sshll.u32 %s592_s7, 4  ;;  %s47_s11 = sshll.u32 %s657_s4, 4  ;;  %s23_s8 = int_to_ptr.vmem [resolvable:$true] %s22_s8  ;;  %s48_s11 = int_to_ptr.hbm [resolvable:$true] %s47_s11 }
   0x8   :  { %25 = dma.hbm_to_vmem [thread:$0]  %s21_s28, 64, %s23_s8, [#allocation3]  }
   0x9   :  { %s61_s13 = sshll.u32 %s658_s5, 4  ;;  %s593_s14 = smov [#allocation7]   ;;  %s62_s13 = int_to_ptr.hbm [resolvable:$true] %s61_s13 }
   0xa   :  { %s49_s15 = sshll.u32 %s593_s14, 4  ;;  %s594_s0 = smov [#allocation8]   ;;  %s50_s15 = int_to_ptr.vmem [resolvable:$true] %s49_s15 }
   0xb   :  { %55 = dma.hbm_to_vmem [thread:$0]  %s48_s11, 1024, %s50_s15, [#allocation6], %s590_s29, %s590_s29, %s591_s30  }
   0xc   :  { %s63_s16 = sshll.u32 %s594_s0, 4  ;;  %s64_s16 = int_to_ptr.vmem [resolvable:$true] %s63_s16 }
   0xd   :  { %66 = dma.hbm_to_vmem [thread:$0]  %s62_s13, 128, %s64_s16, [#allocation9]  }
   0xe   :  { %581 = dma.done.wait [#allocation3], 64  }
   0xf   :  { %582 = vsyncadd [#allocation3], 4294967232 }
  0x10   :  { %583 = dma.done.wait [#allocation6], 2048  }
  0x11   :  { %584 = vsyncadd [#allocation6], 4294965248 }
  0x12   :  { %585 = dma.done.wait [#allocation9], 128  }
  0x13   :  { %586 = vsyncadd [#allocation9], 4294967168  ;;  %v423_v0 = vld [vmem:[%s655_s2] sm:$0xff]  ;;  %vm100_vm0 = vcmask 130048   ;;  %v430_v3 = vld [vmem:[#allocation5 + $0x30] sm:$0xff]  ;;  %v595_v37 = vmov 0   ;;  %v308_v60 = vlaneseq }
  0x14   :  { %v431_v1 = vld [vmem:[#allocation5 + $0x38] sm:$0xff]  ;;  %111 = vmatpush.bf16.msra.mxu0 %v423_v0  ;;  %v429_v4 = vld [vmem:[#allocation5 + $0x28] sm:$0xff]  ;;  %v428_v5 = vld [vmem:[#allocation5 + $0x20] sm:$0xff]  ;;  %449 = vset.pattern.permute.xlu1 %v595_v37  ;;  %s341_s21 = sshll.u32 %s659_s6, 4  ;;  %s342_s21 = int_to_ptr.hbm [resolvable:$true] %s341_s21 }
  0x15   :  { %v84_v2 = vld [vmem:[#allocation2] sm:$0xf]  ;;  %184 = vmatpush.bf16.msra.mxu1 %v431_v1  ;;  %v426_v7 = vld [vmem:[#allocation5 + $0x10] sm:$0xff]  ;;  %v425_v8 = vld [vmem:[#allocation5 + $0x8] sm:$0xff]  ;;  %448 = vset.pattern.permute.xlu0 %v595_v37  ;;  %v309_v62 = vand.u32 127, %v308_v60 }
  0x16   :  { %v427_v6 = vld [vmem:[#allocation5 + $0x18] sm:$0xff]  ;;  %v424_v9 = vld [vmem:[#allocation5] sm:$0xff]  ;;  %v438_v11 = vld [vmem:[#allocation7 + $0x30] sm:$0xff] }
  0x17   :  { %357 = vmatmul.msk.bf16.vlgmr.msra.gmra.mxu0 %vm100_vm0, %v84_v2  ;;  %v439_v10 = vld [vmem:[#allocation7 + $0x38] sm:$0xff]  ;;  %v437_v12 = vld [vmem:[#allocation7 + $0x28] sm:$0xff]  ;;  %v436_v13 = vld [vmem:[#allocation7 + $0x20] sm:$0xff]  ;;  %vm312_vm5 = vcmp.eq.s32.totalorder %v309_v62, 34  ;;  %vm311_vm6 = vcmp.eq.s32.totalorder %v309_v62, 33  ;;  %vm310_vm7 = vcmp.eq.s32.totalorder %v309_v62, 32 }
  0x18   :  { %264 = vmatpush.bf16.msra.mxu2 %v439_v10  ;;  %v435_v14 = vld [vmem:[#allocation7 + $0x18] sm:$0xff]  ;;  %v450_v15 = vld [vmem:[#allocation8] ss:$0 sm:$0xff]  ;;  %v434_v16 = vld [vmem:[#allocation7 + $0x10] sm:$0xff]  ;;  %vm331_vm8 = vcmp.lt.s32.totalorder %v309_v62, 32 }
  0x19   :  { %185 = vmatpush.bf16.msra.mxu1 %v430_v3  ;;  %v433_v22 = vld [vmem:[#allocation7 + $0x8] sm:$0xff]  ;;  %v432_v23 = vld [vmem:[#allocation7] sm:$0xff] }
  0x1a   :  { %v451_v24 = vld [vmem:[#allocation8 + $0x1] ss:$0 sm:$0xff]  ;;  %v452_v30 = vld [vmem:[#allocation8 + $0x2] ss:$0 sm:$0xff]  ;;  %v453_v33 = vld [vmem:[#allocation8 + $0x3] ss:$0 sm:$0xff] }
  0x1b   :  { %v454_v38 = vld [vmem:[#allocation8 + $0x4] ss:$0 sm:$0xff]  ;;  %v85_v39 = vld [vmem:[%s654_s1] sm:$0xff]  ;;  %s596_s1 = smov [#allocation10]  }
  0x1c   :  { %265 = vmatpush.bf16.msra.mxu2 %v438_v11  ;;  %s339_s18 = sshll.u32 %s596_s1, 4  ;;  %s340_s18 = int_to_ptr.vmem [resolvable:$true] %s339_s18 }
  0x1d   :  { %186 = vmatpush.bf16.msra.mxu1 %v429_v4 }
  0x20   :  { %266 = vmatpush.bf16.msra.mxu2 %v437_v12 }
  0x21   :  { %187 = vmatpush.bf16.msra.mxu1 %v428_v5 }
  0x24   :  { %267 = vmatpush.bf16.msra.mxu2 %v436_v13 }
  0x25   :  { %188 = vmatpush.bf16.msra.mxu1 %v427_v6 }
  0x28   :  { %268 = vmatpush.bf16.msra.mxu2 %v435_v14 }
  0x29   :  { %189 = vmatpush.bf16.msra.mxu1 %v426_v7 }
  0x2c   :  { %269 = vmatpush.bf16.msra.mxu2 %v434_v16 }
  0x2d   :  { %190 = vmatpush.bf16.msra.mxu1 %v425_v8 }
  0x30   :  { %270 = vmatpush.bf16.msra.mxu2 %v433_v22 }
  0x31   :  { %191 = vmatpush.bf16.msra.mxu1 %v424_v9 }
  0x34   :  { %271 = vmatpush.bf16.msra.mxu2 %v432_v23 }
  0x94   :  { %v113_v17 = vpop.f32.mrf.mxu0 }
  0x95   :  { %v114_v18 = vadd.f32 %v450_v15, %v113_v17 }
  0x97   :  { %455 = vtanh.f32 %v114_v18 }
  0x9c   :  { %v115_v19 = vpop.f32.mrf.mxu0 }
  0x9d   :  { %v456_v20 = vpop.eup %455 }
  0x9e   :  { %v118_v21 = vpack.c.bf16 %v456_v20, %v456_v20 }
  0xa0   :  { %192 = vmatmul.bf16.vlgmr.msra.gmra.mxu1 %v118_v21 }
 0x11d   :  { %v193_v25 = vpop.f32.mrf.mxu1 }
 0x11e   :  { %v194_v26 = vadd.f32 %v451_v24, %v193_v25 }
 0x120   :  { %v197_v27 = vmax.f32 %v194_v26, 0.0 }
 0x122   :  { %v198_v28 = vpack.c.bf16 %v197_v27, %v197_v27 }
 0x124   :  { %272 = vmatmul.bf16.vlgmr.msra.gmra.mxu2 %v198_v28 }
 0x125   :  { %v195_v29 = vpop.f32.mrf.mxu1 }
 0x1a7   :  { %v273_v31 = vpop.f32.mrf.mxu2 }
 0x1a8   :  { %v274_v32 = vadd.f32 %v452_v30, %v273_v31 }
 0x1aa   :  { %v277_v34 = vmax.f32 %v274_v32, 0.0 }
 0x1ac   :  { %v279_v35 = vmul.f32 %v453_v33, %v277_v34 }
 0x1ae   :  { %280 = vadd.xlane.f32.xlu0 %v279_v35 }
 0x1af   :  { %v275_v36 = vpop.f32.mrf.mxu2 }
 0x221   :  { %v281_v40 = vpop.xlane.xlu0 %280 }
 0x222   :  { %v283_v41 = vadd.f32 %v454_v38, %v281_v40 }
 0x224   :  { %v284_v42 = vsub.f32 %v283_v41, %v85_v39 }
 0x226   :  { %v285_v43 = vand.u32 2147483647, %v284_v42 }
 0x228   :  { %v286_v44 = vsub.f32 0.0, %v285_v43  ;;  %321 = vperm.xlu1 %449, %v285_v43  }
 0x22a   :  { %v422_v45 = vmul.f32 -1.442695, %v286_v44 }
 0x22c   :  { %457 = vpow2.f32 %v422_v45 }
 0x230   :  { %327 = vperm.xlu1 %449, %v283_v41  }
 0x232   :  { %v458_v46 = vpop.eup %457 }
 0x233   :  { %v290_v47 = vadd.f32 1.0, %v458_v46 }
 0x235   :  { %459 = vrcp.f32 %v290_v47  ;;  %v302_v51 = vand.u32 2147483648, %v290_v47  ;;  %v300_v53 = vand.u32 2147483647, %v290_v47  ;;  %vm296_vm2 = vweird.f32 %v290_v47 }
 0x237   :  { %v303_v55 = vor.u32 1.1754944e-38, %v302_v51  ;;  %vm301_vm4 = vcmp.eq.f32.partialorder %v300_v53, 8.507059e+37 }
 0x23b   :  { %v460_v48 = vpop.eup %459 }
 0x23c   :  { %v292_v49 = vmul.f32 %v460_v48, %v290_v47  ;;  %vm297_vm1 = vweird.f32 %v460_v48 }
 0x23d   :  { %vm298_vm3 = vmor %vm296_vm2, %vm297_vm1 }
 0x23e   :  { %v293_v50 = vsub.f32 1.0, %v292_v49 }
 0x240   :  { %v294_v52 = vmul.f32 %v460_v48, %v293_v50 }
 0x242   :  { %v295_v54 = vadd.f32 %v460_v48, %v294_v52 }
 0x244   :  { %v299_v56 = vsel %vm298_vm3, %v460_v48, %v295_v54 }
 0x245   :  { %v304_v57 = vsel %vm301_vm4, %v303_v55, %v299_v56 }
 0x246   :  { %v306_v58 = vmul.f32 2.0, %v304_v57 }
 0x248   :  { %v307_v59 = vmul.f32 %v306_v58, %v285_v43 }
 0x24a   :  { %315 = vperm.xlu0 %448, %v307_v59  }
 0x29a   :  { %v322_v61 = vpop.permute.xlu1 %321 }
 0x2a2   :  { %v328_v1 = vpop.permute.xlu1 %327 }
 0x2bc   :  { %v316_v63 = vpop.permute.xlu0 %315 }
 0x2bd   :  { %v318_v0 = vsel %vm312_vm5, %v316_v63, 0.0 }
 0x2be   :  { %v324_v2 = vsel %vm311_vm6, %v322_v61, %v318_v0 }
 0x2bf   :  { %v330_v3 = vsel %vm310_vm7, %v328_v1, %v324_v2 }
 0x2c0   :  { %v332_v4 = vsel %vm331_vm8, %v277_v34, %v330_v3 }
 0x2c1   :  { %333 = vst [vmem:[#allocation10] sm:$0xff] %v332_v4 }
 0x2c2   :  { %344 = dma.vmem_to_hbm [thread:$0]  %s340_s18, 128, %s342_s21, [#allocation4]  }
 0x2c3   :  { %587 = dma.done.wait [#allocation4], 128  }
 0x2c4   :  { %588 = vsyncadd [#allocation4], 4294967168 }
 0x2c5   :  { %349 = vsyncpa [#allocation3], 1 }
 0x2c6   :  { %350 = vsyncpa [#allocation6], 1 }
 0x2c7   :  { %351 = vsyncpa [#allocation9], 1 }
 0x2c8   :  { %352 = vsyncpa [#allocation4], 1 }

</bundles_post_ra>
